<compile_context>
chip_gen: v6e
topology: v6e:2x2x1
jax: 0.10.0
libtpu: 0.0.40
codegen_flags: <defaults>
</compile_context>

<pallas_src>
import jax
import jax.numpy as jnp
from jax.experimental import pallas as pl
from jax.experimental.pallas import tpu as pltpu


def _dna_linear_kernel(x_ref, w_ref, b_ref, o_ref):
    # x_ref: (TB, F) VMEM   w_ref: (1, F) VMEM   b_ref: (1,) SMEM   o_ref: (TB, 1)
    # VPU broadcast-multiply + XLU lane reduce (no MXU for an N=1 matvec).
    acc = jnp.sum(x_ref[...] * w_ref[...], axis=-1, keepdims=True)  # (TB, 1) f32
    o_ref[...] = (acc + b_ref[0]).astype(o_ref.dtype)


def _round_up(n, m):
    return ((n + m - 1) // m) * m


def dna_linear(x, weight, bias, *, tb=None):
    """x: (B, seq_len, 4); weight: (1, 4*seq_len); bias: (1,)  ->  (B, 1)."""
    B, seq_len, four = x.shape
    assert four == 4, "expected one-hot DNA encoding with last dim 4"
    F = 4 * seq_len

    # Plain-JAX glue: flatten exactly like torch .view on a contiguous tensor.
    x2d = x.reshape(B, F)

    # Batch tile size: multiple of 8 (sublane), ~4 MiB per x tile so the
    # double-buffered footprint fits the default scoped VMEM on all gens.
    if tb is None:
        target_bytes = 4 * 1024 * 1024
        tb = max(8, min(1024, target_bytes // max(F * 4, 1)))
        tb = max(8, (tb // 8) * 8)
    tb = min(tb, _round_up(B, 8))
    tb = max(8, (tb // 8) * 8)

    Bp = _round_up(B, tb)
    if Bp != B:
        x2d = jnp.pad(x2d, ((0, Bp - B), (0, 0)))

    w_row = weight.reshape(1, F).astype(x2d.dtype)   # lane-dense weight (1, F)
    b_smem = bias.reshape(1).astype(jnp.float32)     # scalar bias in SMEM

    out = pl.pallas_call(
        _dna_linear_kernel,
        out_shape=jax.ShapeDtypeStruct((Bp, 1), x.dtype),
        grid_spec=pltpu.PrefetchScalarGridSpec(
            num_scalar_prefetch=0,
            grid=(Bp // tb,),
            in_specs=[
                pl.BlockSpec((tb, F), lambda i: (i, 0)),             # x batch tile
                pl.BlockSpec((1, F), lambda i: (0, 0)),              # resident weight
                pl.BlockSpec(memory_space=pltpu.MemorySpace.SMEM),   # bias scalar
            ],
            out_specs=pl.BlockSpec((tb, 1), lambda i: (i, 0)),
        ),
        compiler_params=pltpu.CompilerParams(
            dimension_semantics=("parallel",)),      # independent batch tiles
    )(x2d, w_row, b_smem)

    return out[:B]


if __name__ == "__main__":
    key = jax.random.PRNGKey(0)
    k_x, k_w, k_b = jax.random.split(key, 3)

    B, seq_len = 8, 8          # small shapes; F = 4*seq_len = 32
    F = 4 * seq_len

    # Deterministic synthetic input: one-hot DNA encoding (B, seq_len, 4).
    idx = jax.random.randint(k_x, (B, seq_len), 0, 4)
    x = jax.nn.one_hot(idx, 4, dtype=jnp.float32)

    # Deterministic parameters mimicking nn.Linear shapes: W (1, F), b (1,).
    bound = 1.0 / (F ** 0.5)
    weight = jax.random.uniform(k_w, (1, F), jnp.float32, -bound, bound)
    bias = jax.random.uniform(k_b, (1,), jnp.float32, -bound, bound)

    out = dna_linear(x, weight, bias)
    out = jax.block_until_ready(out)

    # Reference check in plain JAX (same math as the torch forward).
    ref = x.reshape(B, F) @ weight.T + bias
    assert out.shape == (B, 1)
    assert jnp.allclose(out, ref, atol=1e-5, rtol=1e-5), "mismatch vs reference"

    print("KERNEL_OK")
</pallas_src>

<mosaic_0001>
module attributes {stable_mosaic.version = 11 : i64} {
  func.func @_dna_linear_kernel(%arg0: i32, %arg1: memref<8x32xf32, #tpu.memory_space<vmem>>, %arg2: memref<1x32xf32, #tpu.memory_space<vmem>>, %arg3: memref<1xf32, #tpu.memory_space<smem>>, %arg4: memref<8x1xf32, #tpu.memory_space<vmem>>) attributes {dimension_semantics = [#tpu.dimension_semantics<parallel>], iteration_bounds = array<i64: 1>, scalar_prefetch = 0 : i64, scratch_operands = 0 : i64, tpu.core_type = #tpu.core_type<tc>, window_params = [{transform_indices = @transform_0, window_bounds = array<i64: 8, 32>}, {pipeline_mode = #tpu.pipeline_mode<synchronous>, transform_indices = @transform_1, window_bounds = array<i64: 1, 32>}, {transform_indices = @transform_2, window_bounds = array<i64: 1>}, {transform_indices = @transform_3, window_bounds = array<i64: 8, 1>}]} {
    %c0 = arith.constant 0 : index
    %c0_0 = arith.constant 0 : index
    %0 = vector.load %arg1[%c0, %c0_0] : memref<8x32xf32, #tpu.memory_space<vmem>>, vector<8x32xf32>
    %c0_1 = arith.constant 0 : index
    %c0_2 = arith.constant 0 : index
    %1 = vector.load %arg2[%c0_1, %c0_2] : memref<1x32xf32, #tpu.memory_space<vmem>>, vector<1x32xf32>
    %2 = vector.broadcast %1 : vector<1x32xf32> to vector<8x32xf32>
    %3 = arith.mulf %0, %2 : vector<8x32xf32>
    %cst = arith.constant dense<0.000000e+00> : vector<8xf32>
    %4 = vector.multi_reduction <add>, %3, %cst [1] : vector<8x32xf32> to vector<8xf32>
    %5 = vector.shape_cast %4 : vector<8xf32> to vector<8x1xf32>
    %c0_3 = arith.constant 0 : index
    %6 = memref.load %arg3[%c0_3] : memref<1xf32, #tpu.memory_space<smem>>
    %7 = vector.broadcast %6 : f32 to vector<8x1xf32>
    %8 = arith.addf %5, %7 : vector<8x1xf32>
    %c0_4 = arith.constant 0 : index
    %c0_5 = arith.constant 0 : index
    %9 = vector.load %arg4[%c0_4, %c0_5] : memref<8x1xf32, #tpu.memory_space<vmem>>, vector<8x1xf32>
    tpu.vector_store %arg4[%c0_4, %c0_5], %8 {strides = array<i32>} : memref<8x1xf32, #tpu.memory_space<vmem>>, vector<8x1xf32>,
    return
  }
  func.func @transform_0(%arg0: i32) -> (i32, i32) {
    %c0_i32 = arith.constant 0 : i32
    %c0_i32_0 = arith.constant 0 : i32
    return %arg0, %c0_i32 : i32, i32
  }
  func.func @transform_1(%arg0: i32) -> (i32, i32) {
    %c0_i32 = arith.constant 0 : i32
    %c0_i32_0 = arith.constant 0 : i32
    %c0_i32_1 = arith.constant 0 : i32
    return %c0_i32, %c0_i32_0 : i32, i32
  }
  func.func @transform_2(%arg0: i32) -> i32 {
    %c0_i32 = arith.constant 0 : i32
    %c0_i32_0 = arith.constant 0 : i32
    return %c0_i32 : i32
  }
  func.func @transform_3(%arg0: i32) -> (i32, i32) {
    %c0_i32 = arith.constant 0 : i32
    %c0_i32_0 = arith.constant 0 : i32
    return %arg0, %c0_i32 : i32, i32
  }
}

</mosaic_0001>

<bundles_post_ra>
// kernel: tpu_custom_call.1
= control target key start
LH: loop header
LB: loop body
LE: loop exit
PB: predicated region body
PF: predicated region fallthrough
CT: control target
= control target key end

     0   :  { %9 = vsyncpa [#allocation4], 0  ;;  %s74_s12 = smov [#allocation3]   ;;  %s107_s0 = inlined_call_operand.hbm [shape: f32[8,32], index: 0, kind: input, shape index: {}]   ;;  %s108_s1 = inlined_call_operand.vmem [shape: f32[1,32], index: 1, kind: input, shape index: {}]   ;;  %s109_s2 = inlined_call_operand.<no memory space> [shape: f32[1], index: 2, kind: input, shape index: {}]   ;;  %s110_s3 = inlined_call_operand.vmem [shape: f32[8,1], index: 3, kind: output, shape index: {}]  }
   0x1   :  { %s16_s13 = sshll.u32 %s74_s12, 4  ;;  %s17_s13 = int_to_ptr.vmem [resolvable:$true] %s16_s13 }
   0x2   :  { %s60_s14 = scalar_lea.vmem %s17_s13, 128  ;;  %p65_p1 = scmp.lt.s32.totalorder %s17_s13, %s17_s13 }
   0x3   :  { %p61_p0 = scmp.ne.s32.totalorder %s17_s13, %s60_s14  ;;  %p66_p2 = scmp.lt.s32.totalorder %s60_s14, %s60_s14 }
   0x5   :  { %p67_p3 = por %p66_p2, %p65_p1 }
   0x7   :  { %p68_p4 = pnand %p67_p3, %p61_p0 }
   0x9   :  { %71 = shalt.err (!%p68_p4)
}
   0xa   :  { %19 = dma.hbm_to_vmem [thread:$0]  %s107_s0, 128, %s17_s13, [#allocation4]  }
   0xb   :  { %72 = dma.done.wait [#allocation4], 128  }
   0xc   :  { %73 = vsyncadd [#allocation4], 4294967168  ;;  %v27_v0 = vld [vmem:[#allocation3] sm:$0xff]  ;;  %vm36_vm0 = vcmask 261120   ;;  %v41_v4 = vstv %s109_s2  ;;  %vm43_vm1 = vcmask 7168  }
   0xd   :  { %v50_v1 = vld [vmem:[%s108_s1] ss:$0 sm:$0xff] }
   0xe   :  { %v35_v2 = vmul.f32 %v50_v1, %v27_v0 }
  0x10   :  { %v37_v3 = vsel %vm36_vm0, %v35_v2, 0.0 }
  0x11   :  { %38 = vadd.xlane.f32.xlu0 %v37_v3 }
  0x9a   :  { %v39_v5 = vpop.xlane.xlu0 %38 }
  0x9b   :  { %v42_v6 = vadd.f32 %v41_v4, %v39_v5 }
  0x9d   :  { %44 = vst.msk [vmem:[%s110_s3] sm:$0xff] %vm43_vm1, %v42_v6 }
  0x9e   :  { %49 = vsyncpa [#allocation4], 1 }

</bundles_post_ra>
